<compile_context>
chip_gen: v7x
topology: tpu7x:2x2x1
jax: 0.10.0
libtpu: 0.0.40
codegen_flags: <defaults>
</compile_context>

<pallas_src>
import jax
import jax.numpy as jnp
from jax.experimental import pallas as pl
from jax.experimental.pallas import tpu as pltpu

LEAKY_SLOPE = 0.01  # torch.nn.LeakyReLU default negative_slope
LANE = 128
SUBLANE = 8


def _round_up(x, m):
    return (x + m - 1) // m * m


def _leaky_relu(x):
    # single vselect on the VPU
    return jnp.where(x > 0, x, LEAKY_SLOPE * x)


def mlp_kernel(x_ref, w1_ref, b1_ref, w2_ref, b2_ref, w3_ref, b3_ref, out_ref):
    """Fused 3-layer MLP on one batch tile: (Linear -> LeakyReLU) x2 -> Linear."""
    # In-kernel cast to the weight dtype (no-op for f32 weights, free VPU cast
    # for bf16 weights) — keeps the HBM obs stream at whatever dtype it holds.
    x = x_ref[...].astype(w1_ref.dtype)

    # Layer 1: MXU matmul, f32 accumulation, f32 epilogue (bias + LeakyReLU).
    h = jnp.dot(x, w1_ref[...], preferred_element_type=jnp.float32) + b1_ref[...]
    h = _leaky_relu(h)

    # Layer 2.
    h = jnp.dot(h.astype(w2_ref.dtype), w2_ref[...],
                preferred_element_type=jnp.float32) + b2_ref[...]
    h = _leaky_relu(h)

    # Output layer: logits at the true action_dim (no lane padding on writeback).
    o = jnp.dot(h.astype(w3_ref.dtype), w3_ref[...],
                preferred_element_type=jnp.float32) + b3_ref[...]
    out_ref[...] = o.astype(out_ref.dtype)


def init_params(key, obs_dim, hidden_sizes, action_dim):
    """Deterministic init mimicking nn.Linear default (uniform +-1/sqrt(fan_in)).

    Weights are stored as [in_features, out_features] (transpose of PyTorch's
    nn.Linear [out, in]) so the kernel computes x @ W + b. Biases are kept as
    [1, out_features] rows for a TPU-friendly 2-D layout.
    """
    sizes = [obs_dim] + list(hidden_sizes) + [action_dim]
    params = []
    for fan_in, fan_out in zip(sizes[:-1], sizes[1:]):
        key, kw, kb = jax.random.split(key, 3)
        bound = 1.0 / jnp.sqrt(jnp.float32(fan_in))
        w = jax.random.uniform(kw, (fan_in, fan_out), jnp.float32, -bound, bound)
        b = jax.random.uniform(kb, (1, fan_out), jnp.float32, -bound, bound)
        params.extend([w, b])
    return tuple(params)


def pad_params(params, compute_dtype=None):
    """One-time zero-pad of the *hidden* dims to 128 lanes (numerically inert).

    obs_dim (W1 rows) and action_dim (W3 cols / b3) are left at their true
    widths so the kernel reads obs and writes logits without lane padding.
    Zero hidden columns stay 0 through bias-add and LeakyReLU, so they
    contribute nothing downstream.  Weights may optionally be cast (bf16 MXU
    feed); biases stay f32 for the f32 epilogue.
    """
    w1, b1, w2, b2, w3, b3 = params

    def cast(w):
        return w if compute_dtype is None else w.astype(compute_dtype)

    h1, h2 = w1.shape[1], w2.shape[1]
    h1p, h2p = _round_up(h1, LANE), _round_up(h2, LANE)

    w1p = cast(jnp.pad(w1, ((0, 0), (0, h1p - h1))))           # (obs_dim, h1p)
    b1p = jnp.pad(b1, ((0, 0), (0, h1p - h1)))                  # (1, h1p) f32
    w2p = cast(jnp.pad(w2, ((0, h1p - h1), (0, h2p - h2))))     # (h1p, h2p)
    b2p = jnp.pad(b2, ((0, 0), (0, h2p - h2)))                  # (1, h2p) f32
    w3p = cast(jnp.pad(w3, ((0, h2p - h2), (0, 0))))            # (h2p, action_dim)
    b3p = b3                                                    # (1, action_dim) f32
    return (w1p, b1p, w2p, b2p, w3p, b3p)


def player_model_forward(obs, padded_params, *,
                         tile_b_max=8192,
                         logits_dtype=jnp.float32,
                         vmem_limit_bytes=32 * 1024 * 1024,
                         core_parallel=False):
    """Pallas-backed equivalent of PlayerModelNetwork.forward (recurrent=False).

    Returns (logits, hidden_state) with hidden_state == None, matching the
    PyTorch module.  `padded_params` must come from pad_params().

    Generation notes:
      * v6e/v7x: pass pad_params(..., compute_dtype=jnp.bfloat16) and (ideally)
        bf16 obs from the producer; optionally logits_dtype=jnp.bfloat16 to
        halve writeback.  Accumulation stays f32 inside the kernel.
      * v5e: bf16 weights only (obs/biases f32) avoids multi-pass f32 MXU
        emulation at zero HBM cost (weights are VMEM-resident).
      * v7x: set core_parallel=True to shard the batch grid across both
        TensorCores explicitly; keep vmem_limit_bytes <= ~48 MiB (64 MiB VMEM).
        v5e/v6e may raise it towards ~96 MiB if tiles are pushed bigger.
    """
    w1, b1, w2, b2, w3, b3 = padded_params
    batch, obs_dim = obs.shape
    assert obs_dim == w1.shape[0], "obs feature dim must match W1 rows"
    d_h1, d_h2 = w1.shape[1], w2.shape[1]
    action_dim = w3.shape[1]

    # --- batch tiling ------------------------------------------------------
    # Force tile_b to a sublane multiple, derive tile size from the real batch
    # via cdiv so at most (SUBLANE-1) rows of padding are added, and keep the
    # grid even when >1 so both v7x TensorCores get equal work.
    tile_b_max = max(SUBLANE, (tile_b_max // SUBLANE) * SUBLANE)
    num_tiles = pl.cdiv(batch, tile_b_max)
    if num_tiles > 1 and num_tiles % 2 == 1:
        num_tiles += 1
    tile_b = _round_up(pl.cdiv(batch, num_tiles), SUBLANE)
    padded_batch = tile_b * num_tiles

    obs_p = obs if padded_batch == batch else jnp.pad(
        obs, ((0, padded_batch - batch), (0, 0)))

    sem = (pltpu.CORE_PARALLEL,) if core_parallel else ("parallel",)

    param_bytes = sum(int(p.size) * p.dtype.itemsize for p in padded_params)
    cost = pl.CostEstimate(
        flops=2 * padded_batch * (obs_dim * d_h1 + d_h1 * d_h2
                                  + d_h2 * action_dim),
        transcendentals=0,
        bytes_accessed=int(obs_p.size) * obs_p.dtype.itemsize
                       + padded_batch * action_dim * jnp.dtype(logits_dtype).itemsize
                       + param_bytes,
    )

    def build_call(single_buffer_params):
        def resident(shape):
            # constant block index -> stays in VMEM across all grid steps
            if single_buffer_params:
                return pl.BlockSpec(shape, lambda i: (0, 0),
                                    pipeline_mode=pl.Buffered(1))
            return pl.BlockSpec(shape, lambda i: (0, 0))

        return pl.pallas_call(
            mlp_kernel,
            out_shape=jax.ShapeDtypeStruct((padded_batch, action_dim),
                                           logits_dtype),
            grid=(num_tiles,),
            in_specs=[
                # obs tiles at true width: last dim == full array dim, pipelined
                pl.BlockSpec((tile_b, obs_dim), lambda i: (i, 0)),
                resident(w1.shape), resident(b1.shape),
                resident(w2.shape), resident(b2.shape),
                resident(w3.shape), resident(b3.shape),
            ],
            # logits at true action_dim: last dim == full array dim
            out_specs=pl.BlockSpec((tile_b, action_dim), lambda i: (i, 0)),
            compiler_params=pltpu.CompilerParams(
                dimension_semantics=sem,
                vmem_limit_bytes=vmem_limit_bytes,
            ),
            cost_estimate=cost,
        )

    try:
        logits_p = build_call(True)(obs_p, w1, b1, w2, b2, w3, b3)
    except Exception:
        # Some jax versions reject pipeline_mode=pl.Buffered(1) on pallas_call
        # BlockSpecs; default double-buffering of the ~150 KiB of resident
        # params is harmless, so fall back to it.
        logits_p = build_call(False)(obs_p, w1, b1, w2, b2, w3, b3)

    # Only row padding (if any) is sliced away; no column slice pass anymore.
    logits = logits_p if padded_batch == batch else logits_p[:batch]

    # TODO(synk): recurrent (nn.RNN) branch is not implemented; the module
    # defaults to recurrent=False, so the hidden state stays None.
    return logits, None


def _reference_forward(obs, params):
    w1, b1, w2, b2, w3, b3 = params
    h = _leaky_relu(obs @ w1 + b1)
    h = _leaky_relu(h @ w2 + b2)
    return h @ w3 + b3


if __name__ == "__main__":
    # Small shapes consistent with the module's forward.
    batch, obs_dim, action_dim = 2, 16, 8
    hidden_layer_sizes = [32, 32]

    key = jax.random.PRNGKey(0)
    key, k_obs = jax.random.split(key)
    obs = jax.random.normal(k_obs, (batch, obs_dim), dtype=jnp.float32)

    params = init_params(key, obs_dim, hidden_layer_sizes, action_dim)
    # f32 weights for exact comparison against the reference; pass
    # compute_dtype=jnp.bfloat16 on v5e/v6e/v7x deployments (see docstring).
    padded = pad_params(params, compute_dtype=None)

    logits, hidden = player_model_forward(obs, padded)
    logits = jax.block_until_ready(logits)

    # Sanity check against plain-JAX reference (unpadded params).
    ref = _reference_forward(obs, params)
    assert hidden is None
    assert logits.shape == (batch, action_dim)
    assert jnp.allclose(logits, ref, atol=1e-5, rtol=1e-5)

    print("KERNEL_OK")
</pallas_src>

<mosaic_0001>
module attributes {stable_mosaic.version = 11 : i64} {
  func.func @mlp_kernel(%arg0: i32, %arg1: memref<8x16xf32, #tpu.memory_space<vmem>>, %arg2: memref<16x128xf32, #tpu.memory_space<vmem>>, %arg3: memref<1x128xf32, #tpu.memory_space<vmem>>, %arg4: memref<128x128xf32, #tpu.memory_space<vmem>>, %arg5: memref<1x128xf32, #tpu.memory_space<vmem>>, %arg6: memref<128x8xf32, #tpu.memory_space<vmem>>, %arg7: memref<1x8xf32, #tpu.memory_space<vmem>>, %arg8: memref<8x8xf32, #tpu.memory_space<vmem>>) attributes {dimension_semantics = [#tpu.dimension_semantics<parallel>], iteration_bounds = array<i64: 1>, scalar_prefetch = 0 : i64, scratch_operands = 0 : i64, tpu.core_type = #tpu.core_type<tc>, window_params = [{transform_indices = @transform_0, window_bounds = array<i64: 8, 16>}, {pipeline_mode = #tpu.pipeline_mode<synchronous>, transform_indices = @transform_1, window_bounds = array<i64: 16, 128>}, {pipeline_mode = #tpu.pipeline_mode<synchronous>, transform_indices = @transform_2, window_bounds = array<i64: 1, 128>}, {pipeline_mode = #tpu.pipeline_mode<synchronous>, transform_indices = @transform_3, window_bounds = array<i64: 128, 128>}, {pipeline_mode = #tpu.pipeline_mode<synchronous>, transform_indices = @transform_4, window_bounds = array<i64: 1, 128>}, {pipeline_mode = #tpu.pipeline_mode<synchronous>, transform_indices = @transform_5, window_bounds = array<i64: 128, 8>}, {pipeline_mode = #tpu.pipeline_mode<synchronous>, transform_indices = @transform_6, window_bounds = array<i64: 1, 8>}, {transform_indices = @transform_7, window_bounds = array<i64: 8, 8>}]} {
    %c0 = arith.constant 0 : index
    %c0_0 = arith.constant 0 : index
    %0 = vector.load %arg1[%c0, %c0_0] : memref<8x16xf32, #tpu.memory_space<vmem>>, vector<8x16xf32>
    %c0_1 = arith.constant 0 : index
    %c0_2 = arith.constant 0 : index
    %1 = vector.load %arg2[%c0_1, %c0_2] : memref<16x128xf32, #tpu.memory_space<vmem>>, vector<16x128xf32>
    %cst = arith.constant dense<0.000000e+00> : vector<8x128xf32>
    %2 = tpu.matmul %0, %1, %cst {dimension_numbers = #tpu.dot_dimension_numbers<[1], [0], [0], [1], [0, 0, 1, 1], [], []>} : vector<8x16xf32>, vector<16x128xf32>, vector<8x128xf32> -> vector<8x128xf32>
    %c0_3 = arith.constant 0 : index
    %c0_4 = arith.constant 0 : index
    %3 = vector.load %arg3[%c0_3, %c0_4] : memref<1x128xf32, #tpu.memory_space<vmem>>, vector<1x128xf32>
    %4 = vector.broadcast %3 : vector<1x128xf32> to vector<8x128xf32>
    %5 = arith.addf %2, %4 : vector<8x128xf32>
    %cst_5 = arith.constant 0.000000e+00 : f32
    %6 = vector.broadcast %cst_5 : f32 to vector<8x128xf32>
    %7 = arith.cmpf ogt, %5, %6 : vector<8x128xf32>
    %cst_6 = arith.constant 0.00999999977 : f32
    %8 = vector.broadcast %cst_6 : f32 to vector<8x128xf32>
    %9 = arith.mulf %8, %5 : vector<8x128xf32>
    %10 = arith.select %7, %5, %9 : vector<8x128xi1>, vector<8x128xf32>
    %c0_7 = arith.constant 0 : index
    %c0_8 = arith.constant 0 : index
    %11 = vector.load %arg4[%c0_7, %c0_8] : memref<128x128xf32, #tpu.memory_space<vmem>>, vector<128x128xf32>
    %cst_9 = arith.constant dense<0.000000e+00> : vector<8x128xf32>
    %12 = tpu.matmul %10, %11, %cst_9 {dimension_numbers = #tpu.dot_dimension_numbers<[1], [0], [0], [1], [0, 0, 1, 1], [], []>} : vector<8x128xf32>, vector<128x128xf32>, vector<8x128xf32> -> vector<8x128xf32>
    %c0_10 = arith.constant 0 : index
    %c0_11 = arith.constant 0 : index
    %13 = vector.load %arg5[%c0_10, %c0_11] : memref<1x128xf32, #tpu.memory_space<vmem>>, vector<1x128xf32>
    %14 = vector.broadcast %13 : vector<1x128xf32> to vector<8x128xf32>
    %15 = arith.addf %12, %14 : vector<8x128xf32>
    %cst_12 = arith.constant 0.000000e+00 : f32
    %16 = vector.broadcast %cst_12 : f32 to vector<8x128xf32>
    %17 = arith.cmpf ogt, %15, %16 : vector<8x128xf32>
    %cst_13 = arith.constant 0.00999999977 : f32
    %18 = vector.broadcast %cst_13 : f32 to vector<8x128xf32>
    %19 = arith.mulf %18, %15 : vector<8x128xf32>
    %20 = arith.select %17, %15, %19 : vector<8x128xi1>, vector<8x128xf32>
    %c0_14 = arith.constant 0 : index
    %c0_15 = arith.constant 0 : index
    %21 = vector.load %arg6[%c0_14, %c0_15] : memref<128x8xf32, #tpu.memory_space<vmem>>, vector<128x8xf32>
    %cst_16 = arith.constant dense<0.000000e+00> : vector<8x8xf32>
    %22 = tpu.matmul %20, %21, %cst_16 {dimension_numbers = #tpu.dot_dimension_numbers<[1], [0], [0], [1], [0, 0, 1, 1], [], []>} : vector<8x128xf32>, vector<128x8xf32>, vector<8x8xf32> -> vector<8x8xf32>
    %c0_17 = arith.constant 0 : index
    %c0_18 = arith.constant 0 : index
    %23 = vector.load %arg7[%c0_17, %c0_18] : memref<1x8xf32, #tpu.memory_space<vmem>>, vector<1x8xf32>
    %24 = vector.broadcast %23 : vector<1x8xf32> to vector<8x8xf32>
    %25 = arith.addf %22, %24 : vector<8x8xf32>
    %c0_19 = arith.constant 0 : index
    %c0_20 = arith.constant 0 : index
    %26 = vector.load %arg8[%c0_19, %c0_20] : memref<8x8xf32, #tpu.memory_space<vmem>>, vector<8x8xf32>
    tpu.vector_store %arg8[%c0_19, %c0_20], %25 {strides = array<i32>} : memref<8x8xf32, #tpu.memory_space<vmem>>, vector<8x8xf32>,
    return
  }
  func.func @transform_0(%arg0: i32) -> (i32, i32) {
    %c0_i32 = arith.constant 0 : i32
    %c0_i32_0 = arith.constant 0 : i32
    return %arg0, %c0_i32 : i32, i32
  }
  func.func @transform_1(%arg0: i32) -> (i32, i32) {
    %c0_i32 = arith.constant 0 : i32
    %c0_i32_0 = arith.constant 0 : i32
    %c0_i32_1 = arith.constant 0 : i32
    return %c0_i32, %c0_i32_0 : i32, i32
  }
  func.func @transform_2(%arg0: i32) -> (i32, i32) {
    %c0_i32 = arith.constant 0 : i32
    %c0_i32_0 = arith.constant 0 : i32
    %c0_i32_1 = arith.constant 0 : i32
    return %c0_i32, %c0_i32_0 : i32, i32
  }
  func.func @transform_3(%arg0: i32) -> (i32, i32) {
    %c0_i32 = arith.constant 0 : i32
    %c0_i32_0 = arith.constant 0 : i32
    %c0_i32_1 = arith.constant 0 : i32
    return %c0_i32, %c0_i32_0 : i32, i32
  }
  func.func @transform_4(%arg0: i32) -> (i32, i32) {
    %c0_i32 = arith.constant 0 : i32
    %c0_i32_0 = arith.constant 0 : i32
    %c0_i32_1 = arith.constant 0 : i32
    return %c0_i32, %c0_i32_0 : i32, i32
  }
  func.func @transform_5(%arg0: i32) -> (i32, i32) {
    %c0_i32 = arith.constant 0 : i32
    %c0_i32_0 = arith.constant 0 : i32
    %c0_i32_1 = arith.constant 0 : i32
    return %c0_i32, %c0_i32_0 : i32, i32
  }
  func.func @transform_6(%arg0: i32) -> (i32, i32) {
    %c0_i32 = arith.constant 0 : i32
    %c0_i32_0 = arith.constant 0 : i32
    %c0_i32_1 = arith.constant 0 : i32
    return %c0_i32, %c0_i32_0 : i32, i32
  }
  func.func @transform_7(%arg0: i32) -> (i32, i32) {
    %c0_i32 = arith.constant 0 : i32
    %c0_i32_0 = arith.constant 0 : i32
    return %arg0, %c0_i32 : i32, i32
  }
}

module attributes {stable_mosaic.version = 11 : i64} {
  func.func @mlp_kernel(%arg0: i32, %arg1: memref<8x16xf32, #tpu.memory_space<vmem>>, %arg2: memref<16x128xf32, #tpu.memory_space<vmem>>, %arg3: memref<1x128xf32, #tpu.memory_space<vmem>>, %arg4: memref<128x128xf32, #tpu.memory_space<vmem>>, %arg5: memref<1x128xf32, #tpu.memory_space<vmem>>, %arg6: memref<128x8xf32, #tpu.memory_space<vmem>>, %arg7: memref<1x8xf32, #tpu.memory_space<vmem>>, %arg8: memref<8x8xf32, #tpu.memory_space<vmem>>) attributes {dimension_semantics = [#tpu.dimension_semantics<parallel>], iteration_bounds = array<i64: 1>, scalar_prefetch = 0 : i64, scratch_operands = 0 : i64, tpu.core_type = #tpu.core_type<tc>, window_params = [{transform_indices = @transform_0, window_bounds = array<i64: 8, 16>}, {pipeline_mode = #tpu.pipeline_mode<synchronous>, transform_indices = @transform_1, window_bounds = array<i64: 16, 128>}, {pipeline_mode = #tpu.pipeline_mode<synchronous>, transform_indices = @transform_2, window_bounds = array<i64: 1, 128>}, {pipeline_mode = #tpu.pipeline_mode<synchronous>, transform_indices = @transform_3, window_bounds = array<i64: 128, 128>}, {pipeline_mode = #tpu.pipeline_mode<synchronous>, transform_indices = @transform_4, window_bounds = array<i64: 1, 128>}, {pipeline_mode = #tpu.pipeline_mode<synchronous>, transform_indices = @transform_5, window_bounds = array<i64: 128, 8>}, {pipeline_mode = #tpu.pipeline_mode<synchronous>, transform_indices = @transform_6, window_bounds = array<i64: 1, 8>}, {transform_indices = @transform_7, window_bounds = array<i64: 8, 8>}]} {
    %c0 = arith.constant 0 : index
    %c0_0 = arith.constant 0 : index
    %0 = vector.load %arg1[%c0, %c0_0] : memref<8x16xf32, #tpu.memory_space<vmem>>, vector<8x16xf32>
    %c0_1 = arith.constant 0 : index
    %c0_2 = arith.constant 0 : index
    %1 = vector.load %arg2[%c0_1, %c0_2] : memref<16x128xf32, #tpu.memory_space<vmem>>, vector<16x128xf32>
    %cst = arith.constant dense<0.000000e+00> : vector<8x128xf32>
    %2 = tpu.matmul %0, %1, %cst {dimension_numbers = #tpu.dot_dimension_numbers<[1], [0], [0], [1], [0, 0, 1, 1], [], []>} : vector<8x16xf32>, vector<16x128xf32>, vector<8x128xf32> -> vector<8x128xf32>
    %c0_3 = arith.constant 0 : index
    %c0_4 = arith.constant 0 : index
    %3 = vector.load %arg3[%c0_3, %c0_4] : memref<1x128xf32, #tpu.memory_space<vmem>>, vector<1x128xf32>
    %4 = vector.broadcast %3 : vector<1x128xf32> to vector<8x128xf32>
    %5 = arith.addf %2, %4 : vector<8x128xf32>
    %cst_5 = arith.constant 0.000000e+00 : f32
    %6 = vector.broadcast %cst_5 : f32 to vector<8x128xf32>
    %7 = arith.cmpf ogt, %5, %6 : vector<8x128xf32>
    %cst_6 = arith.constant 0.00999999977 : f32
    %8 = vector.broadcast %cst_6 : f32 to vector<8x128xf32>
    %9 = arith.mulf %8, %5 : vector<8x128xf32>
    %10 = arith.select %7, %5, %9 : vector<8x128xi1>, vector<8x128xf32>
    %c0_7 = arith.constant 0 : index
    %c0_8 = arith.constant 0 : index
    %11 = vector.load %arg4[%c0_7, %c0_8] : memref<128x128xf32, #tpu.memory_space<vmem>>, vector<128x128xf32>
    %cst_9 = arith.constant dense<0.000000e+00> : vector<8x128xf32>
    %12 = tpu.matmul %10, %11, %cst_9 {dimension_numbers = #tpu.dot_dimension_numbers<[1], [0], [0], [1], [0, 0, 1, 1], [], []>} : vector<8x128xf32>, vector<128x128xf32>, vector<8x128xf32> -> vector<8x128xf32>
    %c0_10 = arith.constant 0 : index
    %c0_11 = arith.constant 0 : index
    %13 = vector.load %arg5[%c0_10, %c0_11] : memref<1x128xf32, #tpu.memory_space<vmem>>, vector<1x128xf32>
    %14 = vector.broadcast %13 : vector<1x128xf32> to vector<8x128xf32>
    %15 = arith.addf %12, %14 : vector<8x128xf32>
    %cst_12 = arith.constant 0.000000e+00 : f32
    %16 = vector.broadcast %cst_12 : f32 to vector<8x128xf32>
    %17 = arith.cmpf ogt, %15, %16 : vector<8x128xf32>
    %cst_13 = arith.constant 0.00999999977 : f32
    %18 = vector.broadcast %cst_13 : f32 to vector<8x128xf32>
    %19 = arith.mulf %18, %15 : vector<8x128xf32>
    %20 = arith.select %17, %15, %19 : vector<8x128xi1>, vector<8x128xf32>
    %c0_14 = arith.constant 0 : index
    %c0_15 = arith.constant 0 : index
    %21 = vector.load %arg6[%c0_14, %c0_15] : memref<128x8xf32, #tpu.memory_space<vmem>>, vector<128x8xf32>
    %cst_16 = arith.constant dense<0.000000e+00> : vector<8x8xf32>
    %22 = tpu.matmul %20, %21, %cst_16 {dimension_numbers = #tpu.dot_dimension_numbers<[1], [0], [0], [1], [0, 0, 1, 1], [], []>} : vector<8x128xf32>, vector<128x8xf32>, vector<8x8xf32> -> vector<8x8xf32>
    %c0_17 = arith.constant 0 : index
    %c0_18 = arith.constant 0 : index
    %23 = vector.load %arg7[%c0_17, %c0_18] : memref<1x8xf32, #tpu.memory_space<vmem>>, vector<1x8xf32>
    %24 = vector.broadcast %23 : vector<1x8xf32> to vector<8x8xf32>
    %25 = arith.addf %22, %24 : vector<8x8xf32>
    %c0_19 = arith.constant 0 : index
    %c0_20 = arith.constant 0 : index
    %26 = vector.load %arg8[%c0_19, %c0_20] : memref<8x8xf32, #tpu.memory_space<vmem>>, vector<8x8xf32>
    tpu.vector_store %arg8[%c0_19, %c0_20], %25 {strides = array<i32>} : memref<8x8xf32, #tpu.memory_space<vmem>>, vector<8x8xf32>,
    return
  }
  func.func @transform_0(%arg0: i32) -> (i32, i32) {
    %c0_i32 = arith.constant 0 : i32
    %c0_i32_0 = arith.constant 0 : i32
    return %arg0, %c0_i32 : i32, i32
  }
  func.func @transform_1(%arg0: i32) -> (i32, i32) {
    %c0_i32 = arith.constant 0 : i32
    %c0_i32_0 = arith.constant 0 : i32
    %c0_i32_1 = arith.constant 0 : i32
    return %c0_i32, %c0_i32_0 : i32, i32
  }
  func.func @transform_2(%arg0: i32) -> (i32, i32) {
    %c0_i32 = arith.constant 0 : i32
    %c0_i32_0 = arith.constant 0 : i32
    %c0_i32_1 = arith.constant 0 : i32
    return %c0_i32, %c0_i32_0 : i32, i32
  }
  func.func @transform_3(%arg0: i32) -> (i32, i32) {
    %c0_i32 = arith.constant 0 : i32
    %c0_i32_0 = arith.constant 0 : i32
    %c0_i32_1 = arith.constant 0 : i32
    return %c0_i32, %c0_i32_0 : i32, i32
  }
  func.func @transform_4(%arg0: i32) -> (i32, i32) {
    %c0_i32 = arith.constant 0 : i32
    %c0_i32_0 = arith.constant 0 : i32
    %c0_i32_1 = arith.constant 0 : i32
    return %c0_i32, %c0_i32_0 : i32, i32
  }
  func.func @transform_5(%arg0: i32) -> (i32, i32) {
    %c0_i32 = arith.constant 0 : i32
    %c0_i32_0 = arith.constant 0 : i32
    %c0_i32_1 = arith.constant 0 : i32
    return %c0_i32, %c0_i32_0 : i32, i32
  }
  func.func @transform_6(%arg0: i32) -> (i32, i32) {
    %c0_i32 = arith.constant 0 : i32
    %c0_i32_0 = arith.constant 0 : i32
    %c0_i32_1 = arith.constant 0 : i32
    return %c0_i32, %c0_i32_0 : i32, i32
  }
  func.func @transform_7(%arg0: i32) -> (i32, i32) {
    %c0_i32 = arith.constant 0 : i32
    %c0_i32_0 = arith.constant 0 : i32
    return %arg0, %c0_i32 : i32, i32
  }
}

</mosaic_0001>

<bundles_post_ra>
// kernel: tpu_custom_call.1
= control target key start
LH: loop header
LB: loop body
LE: loop exit
PB: predicated region body
PF: predicated region fallthrough
CT: control target
= control target key end

     0   :  { %12 = vsyncpa [#allocation3], 0  ;;  %s754_s0 = inlined_call_operand.hbm [shape: f32[8,16], index: 0, kind: input, shape index: {}]   ;;  %s755_s1 = inlined_call_operand.vmem [shape: f32[16,128], index: 1, kind: input, shape index: {}]   ;;  %s756_s2 = inlined_call_operand.vmem [shape: f32[1,128], index: 2, kind: input, shape index: {}]   ;;  %s757_s3 = inlined_call_operand.vmem [shape: f32[128,128], index: 3, kind: input, shape index: {}]   ;;  %s758_s4 = inlined_call_operand.vmem [shape: f32[1,128], index: 4, kind: input, shape index: {}]   ;;  %s759_s5 = inlined_call_operand.vmem [shape: f32[128,8], index: 5, kind: input, shape index: {}]   ;;  %s760_s6 = inlined_call_operand.vmem [shape: f32[1,8], index: 6, kind: input, shape index: {}]   ;;  %s761_s7 = inlined_call_operand.hbm [shape: f32[8,8], index: 7, kind: output, shape index: {}]  }
   0x1   :  { %13 = vsyncpa [#allocation4], 0  ;;  %s554_s24 = smov [#allocation2]   ;;  %s506_s28 = scalar_lea.hbm %s754_s0, 128 }
   0x2   :  { %s20_s25 = sshll.u32 %s554_s24, 4  ;;  %p507_p0 = scmp.ne.s32.totalorder %s754_s0, %s506_s28  ;;  %s21_s25 = int_to_ptr.vmem [resolvable:$true] %s20_s25 }
   0x3   :  { %p510_p1 = scmp.lt.u32.totalorder %s506_s28, %s754_s0 }
   0x5   :  { %p512_p2 = pnand %p510_p1, %p507_p0 }
   0x7   :  { %515 = shalt.err (!%p512_p2)
}
   0x8   :  { %s516_s10 = scalar_lea.vmem %s21_s25, 128  ;;  %p521_p4 = scmp.lt.s32.totalorder %s21_s25, %s21_s25 }
   0x9   :  { %p517_p3 = scmp.ne.s32.totalorder %s21_s25, %s516_s10  ;;  %p522_p5 = scmp.lt.s32.totalorder %s516_s10, %s516_s10 }
   0xb   :  { %p523_p6 = por %p522_p5, %p521_p4 }
   0xd   :  { %p524_p7 = pnand %p523_p6, %p517_p3 }
   0xf   :  { %527 = shalt.err (!%p524_p7)
}
  0x10   :  { %23 = dma.hbm_to_vmem [thread:$0]  %s754_s0, 128, %s21_s25, [#allocation3]  }
  0x11   :  { %550 = dma.done.wait [#allocation3], 128  }
  0x12   :  { %551 = vsyncadd [#allocation3], 4294967168  ;;  %v555_v0 = vmov 0.0|0.0   ;;  %vm556_vm0 = vmmov 0   ;;  %v557_v1 = vmov 0.0   ;;  %v40_v2 = vld [vmem:[%s755_s1] sm:$0xff] }
  0x13   :  { %450 = vmatprep.subr.bf16.mxu0 %v555_v0  ;;  %377 = vmatprep.mubr.msk.f32.mxu0 %vm556_vm0, %v557_v1  ;;  %v41_v3 = vld [vmem:[%s755_s1 + $0x8] sm:$0xff]  ;;  %v126_v5 = vld [vmem:[%s757_s3] sm:$0xff]  ;;  %v128_v7 = vld [vmem:[%s757_s3 + $0x10] sm:$0xff]  ;;  %vm49_vm1 = vcmask 130048   ;;  %s558_s9 = smov [#allocation5]   ;;  %vm315_vm4 = vcmask 64512  }
  0x14   :  { %453 = vmatprep.subr.bf16.mxu1 %v555_v0  ;;  %412 = vmatprep.mubr.msk.f32.mxu1 %vm556_vm0, %v557_v1  ;;  %v451_v4 = vpack.c.bf16 %v41_v3, %v40_v2  ;;  %v127_v6 = vld [vmem:[%s757_s3 + $0x8] sm:$0xff]  ;;  %v129_v9 = vld [vmem:[%s757_s3 + $0x18] sm:$0xff]  ;;  %v39_v10 = vld [vmem:[#allocation2] sm:$0xff]  ;;  %s323_s10 = sshll.u32 %s558_s9, 4  ;;  %s324_s10 = int_to_ptr.vmem [resolvable:$true] %s323_s10 }
  0x15   :  { %v454_v8 = vpack.c.bf16 %v127_v6, %v126_v5  ;;  %v457_v11 = vpack.c.bf16 %v129_v9, %v128_v7  ;;  %v130_v12 = vld [vmem:[%s757_s3 + $0x20] sm:$0xff]  ;;  %v131_v13 = vld [vmem:[%s757_s3 + $0x28] sm:$0xff]  ;;  %v132_v15 = vld [vmem:[%s757_s3 + $0x30] sm:$0xff]  ;;  %p533_p9 = scmp.lt.s32.totalorder %s324_s10, %s324_s10 }
  0x16   :  { %452 = vmatpush3.bf16.msra.mxu0 %v451_v4  ;;  %v460_v14 = vpack.c.bf16 %v131_v13, %v130_v12  ;;  %v133_v16 = vld [vmem:[%s757_s3 + $0x38] sm:$0xff]  ;;  %v134_v18 = vld [vmem:[%s757_s3 + $0x40] sm:$0xff]  ;;  %v135_v19 = vld [vmem:[%s757_s3 + $0x48] sm:$0xff] }
  0x17   :  { %455 = vmatpush3.bf16.msra.mxu1 %v454_v8  ;;  %477 = vmatprep.subr.bf16.mxu0 %v555_v0  ;;  %v463_v17 = vpack.c.bf16 %v133_v16, %v132_v15  ;;  %v466_v20 = vpack.c.bf16 %v135_v19, %v134_v18  ;;  %v136_v21 = vld [vmem:[%s757_s3 + $0x50] sm:$0xff]  ;;  %v137_v22 = vld [vmem:[%s757_s3 + $0x58] sm:$0xff]  ;;  %v138_v24 = vld [vmem:[%s757_s3 + $0x60] sm:$0xff] }
  0x18   :  { %456 = vmatprep.subr.bf16.mxu1 %v555_v0  ;;  %v469_v23 = vpack.c.bf16 %v137_v22, %v136_v21  ;;  %v139_v25 = vld [vmem:[%s757_s3 + $0x68] sm:$0xff]  ;;  %v140_v27 = vld [vmem:[%s757_s3 + $0x70] sm:$0xff]  ;;  %v141_v28 = vld [vmem:[%s757_s3 + $0x78] sm:$0xff] }
  0x19   :  { %378 = vmatmul.mubr.msk.f32.vlgmr.msra.gmra.mrb[0].mxu0 %vm49_vm1, %v39_v10  ;;  %v472_v26 = vpack.c.bf16 %v139_v25, %v138_v24  ;;  %v475_v29 = vpack.c.bf16 %v141_v28, %v140_v27  ;;  %v222_v30 = vld [vmem:[%s759_s5] sm:$0xff]  ;;  %v223_v31 = vld [vmem:[%s759_s5 + $0x8] sm:$0xff]  ;;  %v224_v32 = vld [vmem:[%s759_s5 + $0x10] sm:$0xff] }
  0x1a   :  { %447 = vmatprep.mubr.msk.f32.mxu0 %vm556_vm0, %v557_v1  ;;  %v478_v33 = vpack.c.bf16 %v223_v31, %v222_v30  ;;  %v225_v34 = vld [vmem:[%s759_s5 + $0x18] sm:$0xff]  ;;  %v226_v36 = vld [vmem:[%s759_s5 + $0x20] sm:$0xff]  ;;  %v227_v37 = vld [vmem:[%s759_s5 + $0x28] sm:$0xff] }
  0x1b   :  { %458 = vmatpush3.bf16.msra.mxu1 %v457_v11  ;;  %v481_v35 = vpack.c.bf16 %v225_v34, %v224_v32  ;;  %v484_v38 = vpack.c.bf16 %v227_v37, %v226_v36  ;;  %v228_v39 = vld [vmem:[%s759_s5 + $0x30] sm:$0xff]  ;;  %v229_v40 = vld [vmem:[%s759_s5 + $0x38] sm:$0xff]  ;;  %v230_v42 = vld [vmem:[%s759_s5 + $0x40] sm:$0xff] }
  0x1c   :  { %459 = vmatprep.subr.bf16.mxu1 %v555_v0  ;;  %479 = vmatpush3.bf16.msra.mxu0 %v478_v33  ;;  %v487_v41 = vpack.c.bf16 %v229_v40, %v228_v39  ;;  %v231_v43 = vld [vmem:[%s759_s5 + $0x48] sm:$0xff]  ;;  %v232_v45 = vld [vmem:[%s759_s5 + $0x50] sm:$0xff]  ;;  %v233_v46 = vld [vmem:[%s759_s5 + $0x58] sm:$0xff] }
  0x1d   :  { %480 = vmatprep.subr.bf16.mxu0 %v555_v0  ;;  %v490_v44 = vpack.c.bf16 %v231_v43, %v230_v42  ;;  %v493_v47 = vpack.c.bf16 %v233_v46, %v232_v45  ;;  %v234_v48 = vld [vmem:[%s759_s5 + $0x60] sm:$0xff]  ;;  %v235_v49 = vld [vmem:[%s759_s5 + $0x68] sm:$0xff]  ;;  %v236_v57 = vld [vmem:[%s759_s5 + $0x70] sm:$0xff] }
  0x1e   :  { %v496_v50 = vpack.c.bf16 %v235_v49, %v234_v48  ;;  %v332_v51 = vld [vmem:[%s756_s2] ss:$0 sm:$0xff]  ;;  %v237_v58 = vld [vmem:[%s759_s5 + $0x78] sm:$0xff] }
  0x1f   :  { %461 = vmatpush3.bf16.msra.mxu1 %v460_v14  ;;  %v499_v59 = vpack.c.bf16 %v237_v58, %v236_v57  ;;  %v334_v60 = vld [vmem:[%s758_s4] ss:$0 sm:$0xff]  ;;  %s528_s4 = scalar_lea.vmem %s324_s10, 128 }
  0x20   :  { %462 = vmatprep.subr.bf16.mxu1 %v555_v0  ;;  %482 = vmatpush3.bf16.msra.mxu0 %v481_v35  ;;  %v335_v2 = vld [vmem:[%s760_s6] ss:$0 sm:$0xff]  ;;  %p529_p8 = scmp.ne.s32.totalorder %s324_s10, %s528_s4  ;;  %p534_p10 = scmp.lt.s32.totalorder %s528_s4, %s528_s4 }
  0x21   :  { %483 = vmatprep.subr.bf16.mxu0 %v555_v0 }
  0x22   :  { %p535_p11 = por %p534_p10, %p533_p9 }
  0x23   :  { %464 = vmatpush3.bf16.msra.mxu1 %v463_v17 }
  0x24   :  { %465 = vmatprep.subr.bf16.mxu1 %v555_v0  ;;  %485 = vmatpush3.bf16.msra.mxu0 %v484_v38  ;;  %p536_p12 = pnand %p535_p11, %p529_p8 }
  0x25   :  { %486 = vmatprep.subr.bf16.mxu0 %v555_v0 }
  0x27   :  { %467 = vmatpush3.bf16.msra.mxu1 %v466_v20 }
  0x28   :  { %468 = vmatprep.subr.bf16.mxu1 %v555_v0  ;;  %488 = vmatpush3.bf16.msra.mxu0 %v487_v41 }
  0x29   :  { %489 = vmatprep.subr.bf16.mxu0 %v555_v0 }
  0x2b   :  { %470 = vmatpush3.bf16.msra.mxu1 %v469_v23 }
  0x2c   :  { %471 = vmatprep.subr.bf16.mxu1 %v555_v0  ;;  %491 = vmatpush3.bf16.msra.mxu0 %v490_v44 }
  0x2d   :  { %492 = vmatprep.subr.bf16.mxu0 %v555_v0 }
  0x2f   :  { %473 = vmatpush3.bf16.msra.mxu1 %v472_v26 }
  0x30   :  { %474 = vmatprep.subr.bf16.mxu1 %v555_v0  ;;  %494 = vmatpush3.bf16.msra.mxu0 %v493_v47 }
  0x31   :  { %495 = vmatprep.subr.bf16.mxu0 %v555_v0 }
  0x33   :  { %476 = vmatpush3.bf16.msra.mxu1 %v475_v29 }
  0x34   :  { %497 = vmatpush3.bf16.msra.mxu0 %v496_v50 }
  0x35   :  { %498 = vmatprep.subr.bf16.mxu0 %v555_v0 }
  0x38   :  { %500 = vmatpush3.bf16.msra.mxu0 %v499_v59 }
  0xec   :  { %v119_v52 = vpop.f32.mrb[0].mxu0 }
  0xed   :  { %v120_v53 = vadd.f32 %v332_v51, %v119_v52  ;;  %v379_v54 = vpop.f32.mrb[1].mxu0 }
  0xef   :  { %v124_v55 = vmul.f32 0.01, %v120_v53  ;;  %vm123_vm2 = vcmp.gt.f32.partialorder %v120_v53, 0.0 }
  0xf1   :  { %v125_v56 = vsel %vm123_vm2, %v120_v53, %v124_v55 }
  0xf2   :  { %413 = vmatmul.mubr.f32.vlgmr.msra.gmra.mrb[0].mxu1 %v125_v56 }
 0x1c5   :  { %v215_v61 = vpop.f32.mrb[0].mxu1 }
 0x1c6   :  { %v216_v62 = vadd.f32 %v334_v60, %v215_v61  ;;  %v414_v63 = vpop.f32.mrb[1].mxu1 }
 0x1c8   :  { %vm219_vm3 = vcmp.gt.f32.partialorder %v216_v62, 0.0  ;;  %v220_v0 = vmul.f32 0.01, %v216_v62 }
 0x1ca   :  { %v221_v1 = vsel %vm219_vm3, %v216_v62, %v220_v0 }
 0x1cb   :  { %448 = vmatmul.mubr.f32.vlgmr.msra.gmra.mrb[2].mxu0 %v221_v1 }
 0x29e   :  { %v311_v3 = vpop.f32.mrb[2].mxu0 }
 0x29f   :  { %v312_v4 = vadd.f32 %v335_v2, %v311_v3  ;;  %v449_v5 = vpop.f32.mrb[3].mxu0 }
 0x2a1   :  { %316 = vst.msk [vmem:[#allocation5] sm:$0xff] %vm315_vm4, %v312_v4 }
 0x2a2   :  { %539 = shalt.err (!%p536_p12)
}
 0x2a3   :  { %s540_s12 = scalar_lea.hbm %s761_s7, 128 }
 0x2a4   :  { %p541_p13 = scmp.ne.s32.totalorder %s761_s7, %s540_s12  ;;  %p544_p0 = scmp.lt.u32.totalorder %s540_s12, %s761_s7 }
 0x2a6   :  { %p546_p1 = pnand %p544_p0, %p541_p13 }
 0x2a8   :  { %549 = shalt.err (!%p546_p1)
}
 0x2a9   :  { %326 = dma.vmem_to_hbm [thread:$0]  %s324_s10, 128, %s761_s7, [#allocation4]  }
 0x2aa   :  { %552 = dma.done.wait [#allocation4], 128  }
 0x2ab   :  { %553 = vsyncadd [#allocation4], 4294967168 }
 0x2ac   :  { %330 = vsyncpa [#allocation3], 1 }
 0x2ad   :  { %331 = vsyncpa [#allocation4], 1 }

// kernel: tpu_custom_call.1
= control target key start
LH: loop header
LB: loop body
LE: loop exit
PB: predicated region body
PF: predicated region fallthrough
CT: control target
= control target key end

     0   :  { %12 = vsyncpa [#allocation3], 0  ;;  %s754_s0 = inlined_call_operand.hbm [shape: f32[8,16], index: 0, kind: input, shape index: {}]   ;;  %s755_s1 = inlined_call_operand.vmem [shape: f32[16,128], index: 1, kind: input, shape index: {}]   ;;  %s756_s2 = inlined_call_operand.vmem [shape: f32[1,128], index: 2, kind: input, shape index: {}]   ;;  %s757_s3 = inlined_call_operand.vmem [shape: f32[128,128], index: 3, kind: input, shape index: {}]   ;;  %s758_s4 = inlined_call_operand.vmem [shape: f32[1,128], index: 4, kind: input, shape index: {}]   ;;  %s759_s5 = inlined_call_operand.vmem [shape: f32[128,8], index: 5, kind: input, shape index: {}]   ;;  %s760_s6 = inlined_call_operand.vmem [shape: f32[1,8], index: 6, kind: input, shape index: {}]   ;;  %s761_s7 = inlined_call_operand.hbm [shape: f32[8,8], index: 7, kind: output, shape index: {}]  }
   0x1   :  { %13 = vsyncpa [#allocation4], 0  ;;  %s554_s24 = smov [#allocation2]   ;;  %s506_s28 = scalar_lea.hbm %s754_s0, 128 }
   0x2   :  { %s20_s25 = sshll.u32 %s554_s24, 4  ;;  %p507_p0 = scmp.ne.s32.totalorder %s754_s0, %s506_s28  ;;  %s21_s25 = int_to_ptr.vmem [resolvable:$true] %s20_s25 }
   0x3   :  { %p510_p1 = scmp.lt.u32.totalorder %s506_s28, %s754_s0 }
   0x5   :  { %p512_p2 = pnand %p510_p1, %p507_p0 }
   0x7   :  { %515 = shalt.err (!%p512_p2)
}
   0x8   :  { %s516_s10 = scalar_lea.vmem %s21_s25, 128  ;;  %p521_p4 = scmp.lt.s32.totalorder %s21_s25, %s21_s25 }
   0x9   :  { %p517_p3 = scmp.ne.s32.totalorder %s21_s25, %s516_s10  ;;  %p522_p5 = scmp.lt.s32.totalorder %s516_s10, %s516_s10 }
   0xb   :  { %p523_p6 = por %p522_p5, %p521_p4 }
   0xd   :  { %p524_p7 = pnand %p523_p6, %p517_p3 }
   0xf   :  { %527 = shalt.err (!%p524_p7)
}
  0x10   :  { %23 = dma.hbm_to_vmem [thread:$0]  %s754_s0, 128, %s21_s25, [#allocation3]  }
  0x11   :  { %550 = dma.done.wait [#allocation3], 128  }
  0x12   :  { %551 = vsyncadd [#allocation3], 4294967168  ;;  %v555_v0 = vmov 0.0|0.0   ;;  %vm556_vm0 = vmmov 0   ;;  %v557_v1 = vmov 0.0   ;;  %v40_v2 = vld [vmem:[%s755_s1] sm:$0xff] }
  0x13   :  { %450 = vmatprep.subr.bf16.mxu0 %v555_v0  ;;  %377 = vmatprep.mubr.msk.f32.mxu0 %vm556_vm0, %v557_v1  ;;  %v41_v3 = vld [vmem:[%s755_s1 + $0x8] sm:$0xff]  ;;  %v126_v5 = vld [vmem:[%s757_s3] sm:$0xff]  ;;  %v128_v7 = vld [vmem:[%s757_s3 + $0x10] sm:$0xff]  ;;  %vm49_vm1 = vcmask 130048   ;;  %s558_s9 = smov [#allocation5]   ;;  %vm315_vm4 = vcmask 64512  }
  0x14   :  { %453 = vmatprep.subr.bf16.mxu1 %v555_v0  ;;  %412 = vmatprep.mubr.msk.f32.mxu1 %vm556_vm0, %v557_v1  ;;  %v451_v4 = vpack.c.bf16 %v41_v3, %v40_v2  ;;  %v127_v6 = vld [vmem:[%s757_s3 + $0x8] sm:$0xff]  ;;  %v129_v9 = vld [vmem:[%s757_s3 + $0x18] sm:$0xff]  ;;  %v39_v10 = vld [vmem:[#allocation2] sm:$0xff]  ;;  %s323_s10 = sshll.u32 %s558_s9, 4  ;;  %s324_s10 = int_to_ptr.vmem [resolvable:$true] %s323_s10 }
  0x15   :  { %v454_v8 = vpack.c.bf16 %v127_v6, %v126_v5  ;;  %v457_v11 = vpack.c.bf16 %v129_v9, %v128_v7  ;;  %v130_v12 = vld [vmem:[%s757_s3 + $0x20] sm:$0xff]  ;;  %v131_v13 = vld [vmem:[%s757_s3 + $0x28] sm:$0xff]  ;;  %v132_v15 = vld [vmem:[%s757_s3 + $0x30] sm:$0xff]  ;;  %p533_p9 = scmp.lt.s32.totalorder %s324_s10, %s324_s10 }
  0x16   :  { %452 = vmatpush3.bf16.msra.mxu0 %v451_v4  ;;  %v460_v14 = vpack.c.bf16 %v131_v13, %v130_v12  ;;  %v133_v16 = vld [vmem:[%s757_s3 + $0x38] sm:$0xff]  ;;  %v134_v18 = vld [vmem:[%s757_s3 + $0x40] sm:$0xff]  ;;  %v135_v19 = vld [vmem:[%s757_s3 + $0x48] sm:$0xff] }
  0x17   :  { %455 = vmatpush3.bf16.msra.mxu1 %v454_v8  ;;  %477 = vmatprep.subr.bf16.mxu0 %v555_v0  ;;  %v463_v17 = vpack.c.bf16 %v133_v16, %v132_v15  ;;  %v466_v20 = vpack.c.bf16 %v135_v19, %v134_v18  ;;  %v136_v21 = vld [vmem:[%s757_s3 + $0x50] sm:$0xff]  ;;  %v137_v22 = vld [vmem:[%s757_s3 + $0x58] sm:$0xff]  ;;  %v138_v24 = vld [vmem:[%s757_s3 + $0x60] sm:$0xff] }
  0x18   :  { %456 = vmatprep.subr.bf16.mxu1 %v555_v0  ;;  %v469_v23 = vpack.c.bf16 %v137_v22, %v136_v21  ;;  %v139_v25 = vld [vmem:[%s757_s3 + $0x68] sm:$0xff]  ;;  %v140_v27 = vld [vmem:[%s757_s3 + $0x70] sm:$0xff]  ;;  %v141_v28 = vld [vmem:[%s757_s3 + $0x78] sm:$0xff] }
  0x19   :  { %378 = vmatmul.mubr.msk.f32.vlgmr.msra.gmra.mrb[0].mxu0 %vm49_vm1, %v39_v10  ;;  %v472_v26 = vpack.c.bf16 %v139_v25, %v138_v24  ;;  %v475_v29 = vpack.c.bf16 %v141_v28, %v140_v27  ;;  %v222_v30 = vld [vmem:[%s759_s5] sm:$0xff]  ;;  %v223_v31 = vld [vmem:[%s759_s5 + $0x8] sm:$0xff]  ;;  %v224_v32 = vld [vmem:[%s759_s5 + $0x10] sm:$0xff] }
  0x1a   :  { %447 = vmatprep.mubr.msk.f32.mxu0 %vm556_vm0, %v557_v1  ;;  %v478_v33 = vpack.c.bf16 %v223_v31, %v222_v30  ;;  %v225_v34 = vld [vmem:[%s759_s5 + $0x18] sm:$0xff]  ;;  %v226_v36 = vld [vmem:[%s759_s5 + $0x20] sm:$0xff]  ;;  %v227_v37 = vld [vmem:[%s759_s5 + $0x28] sm:$0xff] }
  0x1b   :  { %458 = vmatpush3.bf16.msra.mxu1 %v457_v11  ;;  %v481_v35 = vpack.c.bf16 %v225_v34, %v224_v32  ;;  %v484_v38 = vpack.c.bf16 %v227_v37, %v226_v36  ;;  %v228_v39 = vld [vmem:[%s759_s5 + $0x30] sm:$0xff]  ;;  %v229_v40 = vld [vmem:[%s759_s5 + $0x38] sm:$0xff]  ;;  %v230_v42 = vld [vmem:[%s759_s5 + $0x40] sm:$0xff] }
  0x1c   :  { %459 = vmatprep.subr.bf16.mxu1 %v555_v0  ;;  %479 = vmatpush3.bf16.msra.mxu0 %v478_v33  ;;  %v487_v41 = vpack.c.bf16 %v229_v40, %v228_v39  ;;  %v231_v43 = vld [vmem:[%s759_s5 + $0x48] sm:$0xff]  ;;  %v232_v45 = vld [vmem:[%s759_s5 + $0x50] sm:$0xff]  ;;  %v233_v46 = vld [vmem:[%s759_s5 + $0x58] sm:$0xff] }
  0x1d   :  { %480 = vmatprep.subr.bf16.mxu0 %v555_v0  ;;  %v490_v44 = vpack.c.bf16 %v231_v43, %v230_v42  ;;  %v493_v47 = vpack.c.bf16 %v233_v46, %v232_v45  ;;  %v234_v48 = vld [vmem:[%s759_s5 + $0x60] sm:$0xff]  ;;  %v235_v49 = vld [vmem:[%s759_s5 + $0x68] sm:$0xff]  ;;  %v236_v57 = vld [vmem:[%s759_s5 + $0x70] sm:$0xff] }
  0x1e   :  { %v496_v50 = vpack.c.bf16 %v235_v49, %v234_v48  ;;  %v332_v51 = vld [vmem:[%s756_s2] ss:$0 sm:$0xff]  ;;  %v237_v58 = vld [vmem:[%s759_s5 + $0x78] sm:$0xff] }
  0x1f   :  { %461 = vmatpush3.bf16.msra.mxu1 %v460_v14  ;;  %v499_v59 = vpack.c.bf16 %v237_v58, %v236_v57  ;;  %v334_v60 = vld [vmem:[%s758_s4] ss:$0 sm:$0xff]  ;;  %s528_s4 = scalar_lea.vmem %s324_s10, 128 }
  0x20   :  { %462 = vmatprep.subr.bf16.mxu1 %v555_v0  ;;  %482 = vmatpush3.bf16.msra.mxu0 %v481_v35  ;;  %v335_v2 = vld [vmem:[%s760_s6] ss:$0 sm:$0xff]  ;;  %p529_p8 = scmp.ne.s32.totalorder %s324_s10, %s528_s4  ;;  %p534_p10 = scmp.lt.s32.totalorder %s528_s4, %s528_s4 }
  0x21   :  { %483 = vmatprep.subr.bf16.mxu0 %v555_v0 }
  0x22   :  { %p535_p11 = por %p534_p10, %p533_p9 }
  0x23   :  { %464 = vmatpush3.bf16.msra.mxu1 %v463_v17 }
  0x24   :  { %465 = vmatprep.subr.bf16.mxu1 %v555_v0  ;;  %485 = vmatpush3.bf16.msra.mxu0 %v484_v38  ;;  %p536_p12 = pnand %p535_p11, %p529_p8 }
  0x25   :  { %486 = vmatprep.subr.bf16.mxu0 %v555_v0 }
  0x27   :  { %467 = vmatpush3.bf16.msra.mxu1 %v466_v20 }
  0x28   :  { %468 = vmatprep.subr.bf16.mxu1 %v555_v0  ;;  %488 = vmatpush3.bf16.msra.mxu0 %v487_v41 }
  0x29   :  { %489 = vmatprep.subr.bf16.mxu0 %v555_v0 }
  0x2b   :  { %470 = vmatpush3.bf16.msra.mxu1 %v469_v23 }
  0x2c   :  { %471 = vmatprep.subr.bf16.mxu1 %v555_v0  ;;  %491 = vmatpush3.bf16.msra.mxu0 %v490_v44 }
  0x2d   :  { %492 = vmatprep.subr.bf16.mxu0 %v555_v0 }
  0x2f   :  { %473 = vmatpush3.bf16.msra.mxu1 %v472_v26 }
  0x30   :  { %474 = vmatprep.subr.bf16.mxu1 %v555_v0  ;;  %494 = vmatpush3.bf16.msra.mxu0 %v493_v47 }
  0x31   :  { %495 = vmatprep.subr.bf16.mxu0 %v555_v0 }
  0x33   :  { %476 = vmatpush3.bf16.msra.mxu1 %v475_v29 }
  0x34   :  { %497 = vmatpush3.bf16.msra.mxu0 %v496_v50 }
  0x35   :  { %498 = vmatprep.subr.bf16.mxu0 %v555_v0 }
  0x38   :  { %500 = vmatpush3.bf16.msra.mxu0 %v499_v59 }
  0xec   :  { %v119_v52 = vpop.f32.mrb[0].mxu0 }
  0xed   :  { %v120_v53 = vadd.f32 %v332_v51, %v119_v52  ;;  %v379_v54 = vpop.f32.mrb[1].mxu0 }
  0xef   :  { %v124_v55 = vmul.f32 0.01, %v120_v53  ;;  %vm123_vm2 = vcmp.gt.f32.partialorder %v120_v53, 0.0 }
  0xf1   :  { %v125_v56 = vsel %vm123_vm2, %v120_v53, %v124_v55 }
  0xf2   :  { %413 = vmatmul.mubr.f32.vlgmr.msra.gmra.mrb[0].mxu1 %v125_v56 }
 0x1c5   :  { %v215_v61 = vpop.f32.mrb[0].mxu1 }
 0x1c6   :  { %v216_v62 = vadd.f32 %v334_v60, %v215_v61  ;;  %v414_v63 = vpop.f32.mrb[1].mxu1 }
 0x1c8   :  { %vm219_vm3 = vcmp.gt.f32.partialorder %v216_v62, 0.0  ;;  %v220_v0 = vmul.f32 0.01, %v216_v62 }
 0x1ca   :  { %v221_v1 = vsel %vm219_vm3, %v216_v62, %v220_v0 }
 0x1cb   :  { %448 = vmatmul.mubr.f32.vlgmr.msra.gmra.mrb[2].mxu0 %v221_v1 }
 0x29e   :  { %v311_v3 = vpop.f32.mrb[2].mxu0 }
 0x29f   :  { %v312_v4 = vadd.f32 %v335_v2, %v311_v3  ;;  %v449_v5 = vpop.f32.mrb[3].mxu0 }
 0x2a1   :  { %316 = vst.msk [vmem:[#allocation5] sm:$0xff] %vm315_vm4, %v312_v4 }
 0x2a2   :  { %539 = shalt.err (!%p536_p12)
}
 0x2a3   :  { %s540_s12 = scalar_lea.hbm %s761_s7, 128 }
 0x2a4   :  { %p541_p13 = scmp.ne.s32.totalorder %s761_s7, %s540_s12  ;;  %p544_p0 = scmp.lt.u32.totalorder %s540_s12, %s761_s7 }
 0x2a6   :  { %p546_p1 = pnand %p544_p0, %p541_p13 }
 0x2a8   :  { %549 = shalt.err (!%p546_p1)
}
 0x2a9   :  { %326 = dma.vmem_to_hbm [thread:$0]  %s324_s10, 128, %s761_s7, [#allocation4]  }
 0x2aa   :  { %552 = dma.done.wait [#allocation4], 128  }
 0x2ab   :  { %553 = vsyncadd [#allocation4], 4294967168 }
 0x2ac   :  { %330 = vsyncpa [#allocation3], 1 }
 0x2ad   :  { %331 = vsyncpa [#allocation4], 1 }

</bundles_post_ra>
